<compile_context>
chip_gen: v6e
topology: v6e:2x2x1
jax: 0.10.0
libtpu: 0.0.40
codegen_flags: <defaults>
</compile_context>

<pallas_src>
import functools
import math

import jax
import jax.numpy as jnp
from jax.experimental import pallas as pl
from jax.experimental.pallas import tpu as pltpu

NEG_SLOPE = 0.01  # F.leaky_relu default negative_slope

# ~2 MiB per streamed buffer keeps (<=3 streams x 2 double-buffers) well inside
# the default scoped VMEM on v5e (16 MiB) and v6e/v7x (32 MiB).
_VMEM_BYTES_PER_BUF = 2 * 1024 * 1024


def _choose_tile_n(n, c):
    if n % 128 != 0:
        return n  # small / irregular N: one full-extent tile (== full dim is legal)
    tn = min(n, 2048, _VMEM_BYTES_PER_BUF // (4 * c))
    return max(128, (tn // 128) * 128)


# ---------------------------------------------------------------------------
# Pallas kernels
# ---------------------------------------------------------------------------
def _block0_kernel(p_ref, g_ref, w_ref, b_ref, o_ref, *, inv_count):
    # p_ref: (1, C, TN) raw points (also the residual shortcut)
    # g_ref: (1, C, TN) pre-summed leaky_relu'd kNN neighbors
    # w_ref: (C, 2C) = [W1 | W2],  b_ref: (C, 1) = b1 + k*b2
    p = p_ref[0]                                          # (C, TN)
    lp = jnp.where(p > 0, p, NEG_SLOPE * p)               # leaky_relu (VPU)
    x = jnp.concatenate([lp, g_ref[0]], axis=0)           # (2C, TN)
    acc = jnp.dot(w_ref[...], x,
                  preferred_element_type=jnp.float32)     # (C, TN) single MXU pass
    # mean over (1 + k) folded into a constant multiply (no divide), + shortcut
    o_ref[0] = ((acc + b_ref[...]) * inv_count + p).astype(o_ref.dtype)


def _fused_kernel(p_ref, w_ref, b_ref, o_ref):
    # Blocks > 0 (grouped == points): W = (W1+W2)/2, b = (b1+b2)/2 pre-fused.
    p = p_ref[0]                                          # (C, TN)
    lp = jnp.where(p > 0, p, NEG_SLOPE * p)
    acc = jnp.dot(w_ref[...], lp, preferred_element_type=jnp.float32)
    o_ref[0] = (acc + b_ref[...] + p).astype(o_ref.dtype)


def _res_gcn_block0_pallas(points_bcn, gsum_bcn, w_cat, b_cat, k):
    B, C, N = points_bcn.shape
    TN = _choose_tile_n(N, C)
    kernel = functools.partial(_block0_kernel, inv_count=1.0 / (k + 1.0))
    return pl.pallas_call(
        kernel,
        out_shape=jax.ShapeDtypeStruct((B, C, N), points_bcn.dtype),
        grid_spec=pltpu.PrefetchScalarGridSpec(
            num_scalar_prefetch=0,
            grid=(B, pl.cdiv(N, TN)),
            in_specs=[
                pl.BlockSpec((1, C, TN), lambda b, n: (b, 0, n)),
                pl.BlockSpec((1, C, TN), lambda b, n: (b, 0, n)),
                pl.BlockSpec((C, 2 * C), lambda b, n: (0, 0)),
                pl.BlockSpec((C, 1), lambda b, n: (0, 0)),
            ],
            out_specs=pl.BlockSpec((1, C, TN), lambda b, n: (b, 0, n)),
        ),
        compiler_params=pltpu.CompilerParams(
            dimension_semantics=("parallel", "parallel")),
    )(points_bcn, gsum_bcn, w_cat, b_cat)


def _res_gcn_fused_pallas(points_bcn, w_f, b_f):
    B, C, N = points_bcn.shape
    TN = _choose_tile_n(N, C)
    return pl.pallas_call(
        _fused_kernel,
        out_shape=jax.ShapeDtypeStruct((B, C, N), points_bcn.dtype),
        grid_spec=pltpu.PrefetchScalarGridSpec(
            num_scalar_prefetch=0,
            grid=(B, pl.cdiv(N, TN)),
            in_specs=[
                pl.BlockSpec((1, C, TN), lambda b, n: (b, 0, n)),
                pl.BlockSpec((C, C), lambda b, n: (0, 0)),
                pl.BlockSpec((C, 1), lambda b, n: (0, 0)),
            ],
            out_specs=pl.BlockSpec((1, C, TN), lambda b, n: (b, 0, n)),
        ),
        compiler_params=pltpu.CompilerParams(
            dimension_semantics=("parallel", "parallel")),
    )(points_bcn, w_f, b_f)


# ---------------------------------------------------------------------------
# Glue: kNN neighbor selection + gather-sum (matches knn_point / group)
# ---------------------------------------------------------------------------
# TODO(synk): torch.topk-based kNN selection and the neighbor gather/sum are
# plain JAX glue (no Pallas top-k / gather primitive used here).
def _knn_indices(xyz_bn3, k):
    # dist[b, i, j] = ||xyz[b, i] - xyz[b, j]||^2
    diff = xyz_bn3[:, :, None, :] - xyz_bn3[:, None, :, :]
    dist = jnp.sum(diff * diff, axis=-1)                  # (B, N, N)
    # NB: mirrors torch.topk default largest=True in the reference, bug-for-bug.
    _, idx = jax.lax.top_k(dist, k + 1)
    return idx[:, :, 1:]                                  # (B, N, k)


def _neighbor_sum_bcn(lp_bcn, idx_bnk):
    # g[b, :, i] = sum_s lp[b, :, idx[b, i, s]]   (linear branch pre-reduction)
    return jax.vmap(lambda f, ind: f[:, ind].sum(axis=-1))(lp_bcn, idx_bnk)


# ---------------------------------------------------------------------------
# Module
# ---------------------------------------------------------------------------
class ResGCNd:
    def __init__(self, k, n_cout, n_blocks, indices=None, key=None):
        self.k = k
        self.n_cout = n_cout
        self.n_blocks = n_blocks
        self.indices = indices
        if key is None:
            key = jax.random.PRNGKey(0)
        bound = 1.0 / math.sqrt(n_cout)  # PyTorch Conv2d default init (fan_in = C)
        self.params = []                 # raw (W1, b1, W2, b2), W is (C_out, C_in)
        self._fused = []                 # (W1+W2)/2, (b1+b2)/2  for grouped==points
        for _ in range(n_blocks):
            key, k1, k2, k3, k4 = jax.random.split(key, 5)
            w1 = jax.random.uniform(k1, (n_cout, n_cout), jnp.float32, -bound, bound)
            b1 = jax.random.uniform(k2, (n_cout,), jnp.float32, -bound, bound)
            w2 = jax.random.uniform(k3, (n_cout, n_cout), jnp.float32, -bound, bound)
            b2 = jax.random.uniform(k4, (n_cout,), jnp.float32, -bound, bound)
            self.params.append((w1, b1, w2, b2))
            self._fused.append(((w1 + w2) * 0.5,
                                ((b1 + b2) * 0.5).reshape(n_cout, 1)))
        # block-0 concatenated variant (used only when indices is None)
        w1, b1, w2, b2 = self.params[0]
        self._block0_cat = (jnp.concatenate([w1, w2], axis=1),          # (C, 2C)
                            (b1 + float(k) * b2).reshape(n_cout, 1))    # (C, 1)

    def __call__(self, xyz_b3n, points_bcn):
        # xyz: (B, 3, N), points: (B, C, N) -- PyTorch NCW convention throughout.
        pts = points_bcn
        for blk in range(self.n_blocks):
            if blk == 0 and self.indices is None:
                # leaky_relu before gather (cannot commute with the neighbor-sum)
                lp = jnp.where(pts > 0, pts, NEG_SLOPE * pts)
                xyz_bn3 = jnp.transpose(xyz_b3n, (0, 2, 1))
                idx = _knn_indices(xyz_bn3, self.k)
                gsum = _neighbor_sum_bcn(lp, idx)                       # (B, C, N)
                w_cat, b_cat = self._block0_cat
                pts = _res_gcn_block0_pallas(pts, gsum, w_cat, b_cat, self.k)
            else:
                # grouped == points -> single streamed input, host-fused weights
                w_f, b_f = self._fused[blk]
                pts = _res_gcn_fused_pallas(pts, w_f, b_f)
        return pts                                                      # (B, C, N)


# ---------------------------------------------------------------------------
# Pure-JAX reference (mirrors the PyTorch forward) for a sanity check
# ---------------------------------------------------------------------------
def _reference_forward(model, xyz_b3n, points_bcn):
    pts = points_bcn
    xyzt = jnp.transpose(xyz_b3n, (0, 2, 1))
    hp = jax.lax.Precision.HIGHEST
    for blk in range(model.n_blocks):
        shortcut = pts
        lp = jnp.where(pts > 0, pts, NEG_SLOPE * pts)                   # (B, C, N)
        w1, b1, w2, b2 = model.params[blk]
        center = jnp.einsum("od,bdn->bon", w1, lp, precision=hp) + b1[None, :, None]
        if blk == 0 and model.indices is None:
            idx = _knn_indices(xyzt, model.k)                           # (B, N, k)
            grouped = jax.vmap(lambda f, ind: f[:, ind])(lp, idx)       # (B, C, N, k)
            gout = (jnp.einsum("od,bdnk->bonk", w2, grouped, precision=hp)
                    + b2[None, :, None, None])
            mean = (center + gout.sum(axis=-1)) / (model.k + 1)
        else:
            g = jnp.einsum("od,bdn->bon", w2, lp, precision=hp) + b2[None, :, None]
            mean = (center + g) / 2.0
        pts = mean + shortcut
    return pts


if __name__ == "__main__":
    B, N, C, K, NBLK = 2, 128, 32, 4, 3
    key = jax.random.PRNGKey(0)
    kx, kp, kw = jax.random.split(key, 3)
    xyz = jax.random.normal(kx, (B, 3, N), dtype=jnp.float32)
    points = jax.random.normal(kp, (B, C, N), dtype=jnp.float32)

    model = ResGCNd(k=K, n_cout=C, n_blocks=NBLK, key=kw)

    out = jax.block_until_ready(model(xyz, points))
    assert out.shape == (B, C, N), out.shape
    assert out.dtype == jnp.float32

    ref = jax.block_until_ready(_reference_forward(model, xyz, points))
    assert bool(jnp.allclose(out, ref, rtol=2e-2, atol=2e-2)), \
        f"max abs error {float(jnp.max(jnp.abs(out - ref)))}"

    print("KERNEL_OK")
</pallas_src>

<mosaic_0001>
module attributes {stable_mosaic.version = 11 : i64} {
  func.func @_block0_kernel(%arg0: i32, %arg1: i32, %arg2: memref<1x32x128xf32, #tpu.memory_space<vmem>>, %arg3: memref<1x32x128xf32, #tpu.memory_space<vmem>>, %arg4: memref<32x64xf32, #tpu.memory_space<vmem>>, %arg5: memref<32x1xf32, #tpu.memory_space<vmem>>, %arg6: memref<1x32x128xf32, #tpu.memory_space<vmem>>) attributes {dimension_semantics = [#tpu.dimension_semantics<parallel>, #tpu.dimension_semantics<parallel>], iteration_bounds = array<i64: 2, 1>, scalar_prefetch = 0 : i64, scratch_operands = 0 : i64, tpu.core_type = #tpu.core_type<tc>, window_params = [{transform_indices = @transform_0, window_bounds = array<i64: 1, 32, 128>}, {transform_indices = @transform_1, window_bounds = array<i64: 1, 32, 128>}, {pipeline_mode = #tpu.pipeline_mode<synchronous>, transform_indices = @transform_2, window_bounds = array<i64: 32, 64>}, {pipeline_mode = #tpu.pipeline_mode<synchronous>, transform_indices = @transform_3, window_bounds = array<i64: 32, 1>}, {transform_indices = @transform_4, window_bounds = array<i64: 1, 32, 128>}]} {
    %c0 = arith.constant 0 : index
    %c0_0 = arith.constant 0 : index
    %c0_1 = arith.constant 0 : index
    %0 = vector.load %arg2[%c0, %c0_0, %c0_1] : memref<1x32x128xf32, #tpu.memory_space<vmem>>, vector<1x32x128xf32>
    %1 = vector.shape_cast %0 : vector<1x32x128xf32> to vector<32x128xf32>
    %cst = arith.constant 0.000000e+00 : f32
    %2 = vector.broadcast %cst : f32 to vector<32x128xf32>
    %3 = arith.cmpf ogt, %1, %2 : vector<32x128xf32>
    %cst_2 = arith.constant 0.00999999977 : f32
    %4 = vector.broadcast %cst_2 : f32 to vector<32x128xf32>
    %5 = arith.mulf %4, %1 : vector<32x128xf32>
    %6 = arith.select %3, %1, %5 : vector<32x128xi1>, vector<32x128xf32>
    %c0_3 = arith.constant 0 : index
    %c0_4 = arith.constant 0 : index
    %c0_5 = arith.constant 0 : index
    %7 = vector.load %arg3[%c0_3, %c0_4, %c0_5] : memref<1x32x128xf32, #tpu.memory_space<vmem>>, vector<1x32x128xf32>
    %8 = vector.shape_cast %7 : vector<1x32x128xf32> to vector<32x128xf32>
    %9 = tpu.concatenate %6, %8 in 0 : vector<32x128xf32>, vector<32x128xf32> -> vector<64x128xf32>
    %c0_6 = arith.constant 0 : index
    %c0_7 = arith.constant 0 : index
    %10 = vector.load %arg4[%c0_6, %c0_7] : memref<32x64xf32, #tpu.memory_space<vmem>>, vector<32x64xf32>
    %cst_8 = arith.constant dense<0.000000e+00> : vector<32x128xf32>
    %11 = tpu.matmul %10, %9, %cst_8 {dimension_numbers = #tpu.dot_dimension_numbers<[1], [0], [0], [1], [0, 0, 1, 1], [], []>} : vector<32x64xf32>, vector<64x128xf32>, vector<32x128xf32> -> vector<32x128xf32>
    %c0_9 = arith.constant 0 : index
    %c0_10 = arith.constant 0 : index
    %12 = vector.load %arg5[%c0_9, %c0_10] : memref<32x1xf32, #tpu.memory_space<vmem>>, vector<32x1xf32>
    %13 = vector.broadcast %12 : vector<32x1xf32> to vector<32x128xf32>
    %14 = arith.addf %11, %13 : vector<32x128xf32>
    %cst_11 = arith.constant 2.000000e-01 : f32
    %15 = vector.broadcast %cst_11 : f32 to vector<32x128xf32>
    %16 = arith.mulf %14, %15 : vector<32x128xf32>
    %17 = arith.addf %16, %1 : vector<32x128xf32>
    %c0_12 = arith.constant 0 : index
    %c0_13 = arith.constant 0 : index
    %c0_14 = arith.constant 0 : index
    %18 = vector.load %arg6[%c0_12, %c0_13, %c0_14] : memref<1x32x128xf32, #tpu.memory_space<vmem>>, vector<1x32x128xf32>
    %19 = vector.shape_cast %18 : vector<1x32x128xf32> to vector<32x128xf32>
    %20 = vector.shape_cast %17 : vector<32x128xf32> to vector<1x32x128xf32>
    tpu.vector_store %arg6[%c0_12, %c0_13, %c0_14], %20 {strides = array<i32>} : memref<1x32x128xf32, #tpu.memory_space<vmem>>, vector<1x32x128xf32>,
    return
  }
  func.func @transform_0(%arg0: i32, %arg1: i32) -> (i32, i32, i32) {
    %c0_i32 = arith.constant 0 : i32
    %c0_i32_0 = arith.constant 0 : i32
    return %arg0, %c0_i32, %arg1 : i32, i32, i32
  }
  func.func @transform_1(%arg0: i32, %arg1: i32) -> (i32, i32, i32) {
    %c0_i32 = arith.constant 0 : i32
    %c0_i32_0 = arith.constant 0 : i32
    return %arg0, %c0_i32, %arg1 : i32, i32, i32
  }
  func.func @transform_2(%arg0: i32, %arg1: i32) -> (i32, i32) {
    %c0_i32 = arith.constant 0 : i32
    %c0_i32_0 = arith.constant 0 : i32
    %c0_i32_1 = arith.constant 0 : i32
    return %c0_i32, %c0_i32_0 : i32, i32
  }
  func.func @transform_3(%arg0: i32, %arg1: i32) -> (i32, i32) {
    %c0_i32 = arith.constant 0 : i32
    %c0_i32_0 = arith.constant 0 : i32
    %c0_i32_1 = arith.constant 0 : i32
    return %c0_i32, %c0_i32_0 : i32, i32
  }
  func.func @transform_4(%arg0: i32, %arg1: i32) -> (i32, i32, i32) {
    %c0_i32 = arith.constant 0 : i32
    %c0_i32_0 = arith.constant 0 : i32
    return %arg0, %c0_i32, %arg1 : i32, i32, i32
  }
}

</mosaic_0001>

<bundles_post_ra>
// kernel: tpu_custom_call.1
= control target key start
LH: loop header
LB: loop body
LE: loop exit
PB: predicated region body
PF: predicated region fallthrough
CT: control target
= control target key end

     0   :  { %s1124_s0 = inlined_call_operand.hbm [shape: f32[2,32,128], index: 0, kind: input, shape index: {}]   ;;  %s1125_s1 = inlined_call_operand.hbm [shape: f32[2,32,128], index: 1, kind: input, shape index: {}]   ;;  %s1126_s2 = inlined_call_operand.vmem [shape: f32[32,64], index: 2, kind: input, shape index: {}]   ;;  %s1127_s3 = inlined_call_operand.vmem [shape: f32[32,1], index: 3, kind: input, shape index: {}]   ;;  %s1128_s4 = inlined_call_operand.hbm [shape: f32[2,32,128], index: 4, kind: output, shape index: {}]  }
   0x1   :  { %1130 = sst [smem:[#allocation12_spill]] %s1124_s0 }
   0x2   :  { %9 = vsyncpa [#allocation3], 0 }
   0x3   :  { %11 = vsyncpa [#allocation3 + $0x1], 0 }
   0x4   :  { %12 = vsyncpa [#allocation6], 0 }
   0x5   :  { %14 = vsyncpa [#allocation6 + $0x1], 0 }
   0x6   :  { %15 = vsyncpa [#allocation4], 0 }
   0x7   :  { %17 = vsyncpa [#allocation4 + $0x1], 0  ;;  %s884_s15 = smov 0   ;;  %s886_s16 = smov 0  }
   0x8   :  { %s888_s17 = smov 0   ;;  %s890_s18 = smov 0  }
   0x9   :  { %s892_s19 = smov 0   ;;  %s894_s20 = smov 0  }
   0xa LB: > { %s559_s21 = sadd.s32 4294967295, %s849_s20   ;;  %s560_s22 = sadd.s32 4294967294, %s849_s20   ;;  %s849_s20 = sphi %s894_s20, %s23_s20   ;;  %s845_s19 = sphi %s892_s19, %s1144_s19   ;;  %s841_s18 = sphi %s890_s18, %s1143_s18   ;;  %s837_s17 = sphi %s888_s17, %s1142_s17   ;;  %s833_s16 = sphi %s886_s16, %s1141_s16   ;;  %s829_s15 = sphi %s884_s15, %s1140_s15  }
   0xb   : > { %s35_s23 = sadd.s32 1, %s845_s19  ;;  %s44_s24 = sadd.s32 1, %s837_s17 }
   0xc   : > { %p37_p0 = scmp.ge.s32.totalorder %s35_s23, 2  ;;  %p51_p1 = scmp.ne.s32.totalorder %s837_s17, %s833_s16 }
   0xd   : > { %p52_p2 = scmp.eq.s32.totalorder %s849_s20, 0  ;;  %p57_p3 = scmp.ne.s32.totalorder %s833_s16, %s829_s15 }
   0xe   : > { %s1146_s23 = smov (%p37_p0, %s35_s23), 0  ;;  %p58_p5 = scmp.eq.s32.totalorder %s559_s21, 0 }
   0xf   : > { %1131 = sst [smem:[#allocation11_spill]] %s1146_s23  ;;  %p925_p4 = por %p52_p2, %p51_p1 }
  0x10   : > { %s39_s26 = ssub.s32 %s845_s19, %s1146_s23  ;;  %p153_p6 = scmp.eq.s32.totalorder %s559_s21, 1 }
  0x11   : > { %p42_p7 = scmp.eq.s32.totalorder %s39_s26, 0  ;;  %p931_p8 = por %p58_p5, %p57_p3 }
  0x12   : > { %p935_p9 = por %p153_p6, %p51_p1  ;;  %p159_p10 = scmp.eq.s32.totalorder %s560_s22, 1 }
  0x13   : > { %s940_s29 = scalar_select %p42_p7, %s837_s17, %s44_s24  }
  0x14   : > { %p942_p11 = por %p159_p10, %p57_p3  ;;  %p562_p12 = scmp.ge.s32.totalorder %s849_s20, 2 }
  0x15   : > { %p652_p13 = scmp.lt.s32.totalorder %s849_s20, 2  ;;  %s949_s5 = sand.u32 1, %s837_s17  }
  0x16   : > { %s563_s6 = sshll.u32 %s949_s5, 5  ;;  %s582_s7 = sshll.u32 %s845_s19, 9 }
  0x17   : > { %s1136_s0 = sld [smem:[#allocation12_spill]]  ;;  %s189_s11 = scalar_lea.vmem [#allocation2], %s563_s6 }
  0x18   : > { %s197_s12 = sshll.u32 %s189_s11, 4  ;;  %p962_p0 = pnand %p652_p13, %p925_p4  ;;  %s198_s12 = int_to_ptr.vmem [resolvable:$true] %s197_s12 }
  0x19   : > { %p569_p1 = scmp.ge.s32.totalorder %s849_s20, 1  ;;  %s186_s14 = scalar_lea.sflag [#allocation3], %s949_s5 }
  0x1a   : > { %p711_p2 = pneg %p962_p0  ;;  %s722_s21 = scalar_lea.vmem %s198_s12, 512 }
  0x1b   : > { %p723_p3 = scmp.ne.s32.totalorder %s198_s12, %s722_s21  ;;  %s851_s22 = smov [#allocation2]  }
  0x1c   : > { %s727_s24 = sshll.u32 %s851_s22, 4  ;;  %s728_s24 = int_to_ptr.vmem [resolvable:$false] %s727_s24 }
  0x1d   : > { %s196_s10 = scalar_lea.hbm %s1136_s0, %s582_s7  ;;  %p725_p5 = pnand %p723_p3, %p711_p2 }
  0x1e   : > { %s729_s25 = scalar_lea.vmem %s728_s24, 1024  ;;  %p730_p4 = scmp.lt.s32.totalorder %s198_s12, %s728_s24 }
  0x1f   : > { %p726_p6 = pneg %p725_p5  ;;  %p731_p7 = scmp.lt.s32.totalorder %s729_s25, %s722_s21 }
  0x21   : > { %p732_p10 = por %p731_p7, %p730_p4 }
  0x23   : > { %p733_p13 = pnand %p732_p10, %p726_p6 }
  0x25   : > { %736 = shalt.err (!%p733_p13)
}
  0x26   : > { %s852_s26 = smov 128   ;;  %s853_s8 = smov 8  }
  0x27   : > { %644 = dma.hbm_to_vmem [thread:$0]  (!%p962_p0), %s196_s10, 512, %s198_s12, %s186_s14, %s852_s26, %s852_s26, %s853_s8  }
  0x28   : > { %p227_p3 = scmp.lt.s32.totalorder %s849_s20, 3  ;;  %s218_s21 = scalar_lea.hbm %s1125_s1, %s582_s7 }
  0x29   : > { %s211_s24 = scalar_lea.vmem [#allocation5], %s563_s6  ;;  %s208_s0 = scalar_lea.sflag [#allocation6], %s949_s5 }
  0x2a   : > { %p983_p5 = pnand %p569_p1, %p227_p3  ;;  %s219_s25 = sshll.u32 %s211_s24, 4  ;;  %s220_s25 = int_to_ptr.vmem [resolvable:$true] %s219_s25 }
  0x2b   : > { %s750_s23 = scalar_lea.vmem %s220_s25, 512  ;;  %s854_s10 = smov [#allocation5]  }
  0x2c   : > { %p751_p6 = scmp.ne.s32.totalorder %s220_s25, %s750_s23  ;;  %s755_s12 = sshll.u32 %s854_s10, 4  ;;  %s756_s12 = int_to_ptr.vmem [resolvable:$false] %s755_s12 }
  0x2d   : > { %s757_s7 = scalar_lea.vmem %s756_s12, 1024  ;;  %p758_p10 = scmp.lt.s32.totalorder %s220_s25, %s756_s12 }
  0x2e   : > { %p753_p4 = pnand %p751_p6, %p711_p2  ;;  %p759_p1 = scmp.lt.s32.totalorder %s757_s7, %s750_s23 }
  0x30   : > { %p754_p7 = pneg %p753_p4  ;;  %p760_p13 = por %p759_p1, %p758_p10 }
  0x32   : > { %p761_p3 = pnand %p760_p13, %p754_p7 }
  0x34   : > { %764 = shalt.err (!%p761_p3)
}
  0x35   : > { %647 = dma.hbm_to_vmem [thread:$0]  (!%p962_p0), %s218_s21, 512, %s220_s25, %s208_s0, %s852_s26, %s852_s26, %s853_s8  }
  0x36   : > { %231 = sbr.rel (%p983_p5) target bundleno = 296 (0x128), region = 36  ;;  %s998_s5 = sand.u32 (!%p983_p5), 1, %s833_s16  }
  0x37   : > { %s1001_s6 = sshll.u32 (!%p983_p5), %s998_s5, 5  ;;  %s234_s14 = scalar_lea.sflag (!%p983_p5), [#allocation3], %s998_s5 }
  0x38   : > { %s1005_s23 = scalar_lea.vmem (!%p983_p5), [#allocation2], %s1001_s6 }
  0x3b   : > { %816 = dma.done.wait (%p931_p8), %s234_s14, 512  }
  0x3c   : > { %818 = vsyncadd (%p931_p8), %s234_s14, 4294966784  ;;  %s243_s0 = scalar_lea.sflag [#allocation6], %s998_s5  ;;  %s246_s13 = scalar_lea.vmem [#allocation5], %s1001_s6 }
  0x3d   : > { %820 = dma.done.wait (%p931_p8), %s243_s0, 512  }
  0x3e   : > { %822 = vsyncadd (%p931_p8), %s243_s0, 4294966784  ;;  %v855_v0 = vmov 0   ;;  %v295_v1 = vld [vmem:[%s246_s13 + $0x18] sm:$0xff]  ;;  %v294_v2 = vld [vmem:[%s246_s13 + $0x10] sm:$0xff]  ;;  %vm324_vm4 = vcmask 523264   ;;  %s275_s27 = scalar_lea.vmem [#allocation7], %s1001_s6 }
  0x3f   : > { %708 = vset.pattern.permute.xlu1 %v855_v0  ;;  %707 = vset.pattern.permute.xlu0 %v855_v0  ;;  %v1018_v3 = vld [vmem:[%s1005_s23 + $0x18] sm:$0xff]  ;;  %v1021_v4 = vld [vmem:[%s1005_s23 + $0x10] sm:$0xff]  ;;  %v293_v5 = vld [vmem:[%s246_s13 + $0x8] sm:$0xff]  ;;  %s449_s26 = sshll.u32 %s275_s27, 4  ;;  %s584_s8 = sshll.u32 %s841_s18, 9  ;;  %s1068_s26 = int_to_ptr.vmem [resolvable:$true] %s449_s26 }
  0x40   : > { %597 = vmatprep.subr.mxu0 %v295_v1  ;;  %619 = vmatprep.subr.mxu1 %v295_v1  ;;  %v287_v6 = vmul.f32 0.01, %v1018_v3  ;;  %vm283_vm0 = vcmp.gt.f32.partialorder %v1018_v3, 0.0  ;;  %v1026_v7 = vld [vmem:[%s1005_s23 + $0x8] sm:$0xff]  ;;  %v292_v8 = vld [vmem:[%s246_s13] sm:$0xff]  ;;  %vm282_vm1 = vcmp.gt.f32.partialorder %v1021_v4, 0.0  ;;  %s1074_s11 = scalar_lea.hbm %s1128_s4, %s584_s8 }
  0x41   : > { %598 = vmatpush3.msra.mxu0 %v295_v1  ;;  %627 = vmatpush3.msra.mxu1 %v295_v1  ;;  %v286_v9 = vmul.f32 0.01, %v1021_v4  ;;  %v1031_v10 = vld [vmem:[%s1005_s23] sm:$0xff]  ;;  %v285_v12 = vmul.f32 0.01, %v1026_v7  ;;  %vm281_vm2 = vcmp.gt.f32.partialorder %v1026_v7, 0.0 }
  0x42   : > { %599 = vmatprep.subr.mxu0 %v294_v2  ;;  %620 = vmatprep.subr.mxu1 %v294_v2  ;;  %v291_v11 = vsel %vm283_vm0, %v1018_v3, %v287_v6  ;;  %v284_v14 = vmul.f32 0.01, %v1031_v10  ;;  %vm280_vm3 = vcmp.gt.f32.partialorder %v1031_v10, 0.0  ;;  %v296_v17 = vld [vmem:[%s1126_s2] sm:$0xff]  ;;  %v298_v18 = vld [vmem:[%s1126_s2 + $0x10] sm:$0xff]  ;;  %v297_v19 = vld [vmem:[%s1126_s2 + $0x8] sm:$0xff] }
  0x43   : > { %600 = vmatpush3.msra.mxu0 %v294_v2  ;;  %628 = vmatpush3.msra.mxu1 %v294_v2  ;;  %v290_v13 = vsel %vm282_vm1, %v1021_v4, %v286_v9  ;;  %v289_v15 = vsel %vm281_vm2, %v1026_v7, %v285_v12  ;;  %v299_v20 = vld [vmem:[%s1126_s2 + $0x18] sm:$0xff]  ;;  %v302_v21 = vld [vmem:[%s1127_s3 + $0x10] sm:$0xff]  ;;  %v300_v22 = vld [vmem:[%s1127_s3] sm:$0xff]  ;;  %s435_s18 = scalar_lea.sflag [#allocation4], %s998_s5  ;;  %s765_s21 = scalar_lea.vmem %s1068_s26, 512 }
  0x44   : > { %601 = vmatprep.subr.mxu0 %v293_v5  ;;  %621 = vmatprep.subr.mxu1 %v293_v5  ;;  %v288_v16 = vsel %vm280_vm3, %v1031_v10, %v284_v14  ;;  %v303_v23 = vld [vmem:[%s1127_s3 + $0x18] sm:$0xff]  ;;  %v301_v24 = vld [vmem:[%s1127_s3 + $0x8] sm:$0xff]  ;;  %p766_p8 = scmp.ne.s32.totalorder %s1068_s26, %s765_s21  ;;  %s856_s22 = smov [#allocation7]  }
  0x45   : > { %602 = vmatpush3.msra.mxu0 %v293_v5  ;;  %629 = vmatpush3.msra.mxu1 %v293_v5  ;;  %s769_s24 = sshll.u32 %s856_s22, 4  ;;  %s770_s24 = int_to_ptr.vmem [resolvable:$false] %s769_s24 }
  0x46   : > { %603 = vmatprep.subr.mxu0 %v292_v8  ;;  %622 = vmatprep.subr.mxu1 %v292_v8  ;;  %p767_p0 = pnand %p766_p8, %p935_p9  ;;  %s771_s25 = scalar_lea.vmem %s770_s24, 1024 }
  0x47   : > { %604 = vmatpush3.msra.mxu0 %v292_v8  ;;  %630 = vmatpush3.msra.mxu1 %v292_v8  ;;  %p772_p5 = scmp.lt.s32.totalorder %s1068_s26, %s770_s24  ;;  %p773_p6 = scmp.lt.s32.totalorder %s771_s25, %s765_s21 }
  0x48   : > { %605 = vmatprep.subr.mxu0 %v291_v11  ;;  %623 = vmatprep.subr.mxu1 %v291_v11  ;;  %p768_p2 = pneg %p767_p0 }
  0x49   : > { %606 = vmatpush3.msra.mxu0 %v291_v11  ;;  %631 = vmatpush3.msra.mxu1 %v291_v11  ;;  %p774_p4 = por %p773_p6, %p772_p5 }
  0x4a   : > { %607 = vmatprep.subr.mxu0 %v290_v13  ;;  %624 = vmatprep.subr.mxu1 %v290_v13 }
  0x4b   : > { %608 = vmatpush3.msra.mxu0 %v290_v13  ;;  %632 = vmatpush3.msra.mxu1 %v290_v13  ;;  %p775_p7 = pnand %p774_p4, %p768_p2 }
  0x4c   : > { %609 = vmatprep.subr.mxu0 %v289_v15  ;;  %625 = vmatprep.subr.mxu1 %v289_v15 }
  0x4d   : > { %610 = vmatpush3.msra.mxu0 %v289_v15  ;;  %633 = vmatpush3.msra.mxu1 %v289_v15 }
  0x4e   : > { %611 = vmatprep.subr.mxu0 %v288_v16  ;;  %626 = vmatprep.subr.mxu1 %v288_v16 }
  0x4f   : > { %612 = vmatpush3.msra.mxu0 %v288_v16  ;;  %634 = vmatpush3.msra.mxu1 %v288_v16 }
  0x50   : > { %613 = vmatprep.mubr.msk.f32.mxu0 %vm324_vm4, %v296_v17  ;;  %616 = vmatprep.mubr.msk.f32.mxu1 %vm324_vm4, %v298_v18 }
  0x51   : > { %614 = vmatmul.mubr.msk.f32.vlgmr.msra.gmra.mxu0 %vm324_vm4, %v297_v19  ;;  %617 = vmatmul.mubr.msk.f32.vlgmr.msra.gmra.mxu1 %vm324_vm4, %v299_v20 }
  0x52   : > { %316 = vperm.xlu1 %708, %v302_v21   ;;  %306 = vperm.xlu0 %707, %v300_v22  }
  0x56   : > { %321 = vperm.xlu1 %708, %v303_v23   ;;  %311 = vperm.xlu0 %707, %v301_v24  }
  0xcd   : > { %v317_v25 = vpop.permute.xlu1 %316  ;;  %v307_v26 = vpop.permute.xlu0 %306 }
  0xd1   : > { %v322_v27 = vpop.permute.xlu1 %321  ;;  %v312_v28 = vpop.permute.xlu0 %311 }
 0x111   : > { %v615_v29 = vpop.f32.mrf.mxu0  ;;  %v618_v30 = vpop.f32.mrf.mxu1 }
 0x112   : > { %v409_v31 = vadd.f32 %v615_v29, %v312_v28  ;;  %v419_v32 = vadd.f32 %v618_v30, %v322_v27 }
 0x113   : > { %v403_v33 = vpop.f32.mrf.mxu0  ;;  %v413_v34 = vpop.f32.mrf.mxu1 }
 0x114   : > { %v423_v35 = vmul.f32 0.2, %v409_v31  ;;  %v425_v36 = vmul.f32 0.2, %v419_v32  ;;  %v404_v37 = vadd.f32 %v403_v33, %v307_v26  ;;  %v414_v38 = vadd.f32 %v413_v34, %v317_v25 }
 0x116   : > { %v427_v39 = vadd.f32 %v423_v35, %v1026_v7  ;;  %v429_v40 = vadd.f32 %v425_v36, %v1018_v3  ;;  %v422_v41 = vmul.f32 0.2, %v404_v37  ;;  %v424_v42 = vmul.f32 0.2, %v414_v38 }
 0x118   : > { %431 = vst [vmem:[%s275_s27 + $0x8] sm:$0xff] %v427_v39  ;;  %433 = vst [vmem:[%s275_s27 + $0x18] sm:$0xff] %v429_v40  ;;  %v426_v43 = vadd.f32 %v422_v41, %v1031_v10  ;;  %v428_v44 = vadd.f32 %v424_v42, %v1021_v4 }
 0x11a   : > { %430 = vst [vmem:[%s275_s27] sm:$0xff] %v426_v43  ;;  %432 = vst [vmem:[%s275_s27 + $0x10] sm:$0xff] %v428_v44 }
 0x11b   : > { %778 = shalt.err (!%p775_p7)
}
 0x11c   : > { %s779_s10 = scalar_lea.hbm %s1074_s11, 512  ;;  %s783_s14 = scalar_lea.hbm %s1128_s4, 1024 }
 0x11d   : > { %p780_p10 = scmp.ne.s32.totalorder %s1074_s11, %s779_s10  ;;  %p784_p3 = scmp.lt.s32.totalorder %s1074_s11, %s1128_s4 }
 0x11e   : > { %p785_p8 = scmp.lt.s32.totalorder %s783_s14, %s779_s10 }
 0x11f   : > { %p781_p1 = pnand %p780_p10, %p935_p9 }
 0x120   : > { %p786_p0 = por %p785_p8, %p784_p3 }
 0x121   : > { %p782_p13 = pneg %p781_p1 }
 0x123   : > { %p787_p2 = pnand %p786_p0, %p782_p13 }
 0x125   : > { %790 = shalt.err (!%p787_p2)
}
 0x126   : > { %s857_s13 = smov 128   ;;  %s858_s27 = smov 8  }
 0x127   : > { %639 = dma.vmem_to_hbm [thread:$0]  (%p935_p9), %s1068_s26, 512, %s1074_s11, %s435_s18, %s857_s13, %s857_s13, %s858_s27  }
 0x128 PF: > { %s464_s8 = sand.u32 1, %s829_s15   ;;  %p649_p5 = pnand %p562_p12, %p942_p11 }
 0x129   : > { %s465_s6 = scalar_lea.sflag [#allocation4], %s464_s8 }
 0x12a   : > { %p650_p6 = pneg %p649_p5 }
 0x12c   : > { %824 = dma.done.wait (%p650_p6), %s465_s6, 512  }
 0x12d   : > { %826 = vsyncadd (%p650_p6), %s465_s6, 4294966784  ;;  %s23_s20 = sadd.s32 1, %s849_s20   ;;  %s1139_s28 = sld [smem:[#allocation11_spill]] }
 0x12e   : > { %p20_p4 = scmp.ge.s32.totalorder %s23_s20, 4   ;;  %s1140_s15 = smov %s833_s16 }
 0x12f   : > { %s1141_s16 = smov %s837_s17  ;;  %s1142_s17 = smov %s940_s29 }
 0x130   : > { %s1143_s18 = smov %s845_s19  ;;  %22 = sbr.rel (!%p20_p4) target bundleno = 10 (0xa), region = 94 }
 0x133   : > { %s1144_s19 = smov %s1139_s28 }
 0x135   :  { %470 = vsyncpa [#allocation3], 1 }
 0x136   :  { %472 = vsyncpa [#allocation3 + $0x1], 1 }
 0x137   :  { %473 = vsyncpa [#allocation6], 1 }
 0x138   :  { %475 = vsyncpa [#allocation6 + $0x1], 1 }
 0x139   :  { %476 = vsyncpa [#allocation4], 1 }
 0x13a   :  { %478 = vsyncpa [#allocation4 + $0x1], 1 }

</bundles_post_ra>
